<compile_context>
chip_gen: v7x
topology: tpu7x:2x2x1
jax: 0.10.0
libtpu: 0.0.40
codegen_flags: <defaults>
</compile_context>

<pallas_src>
import functools

import jax
import jax.numpy as jnp
from jax import lax
from jax.experimental import pallas as pl
from jax.experimental.pallas import tpu as pltpu


def _angle_rkd_loss_kernel(s_ref, t_ref, o_ref, *, n, loss_weight,
                           with_l2_norm, eps, beta):
    """Computes the full AngleWiseRKD loss for one batch in one invocation.

    s_ref, t_ref : (n, d) f32 VMEM (student / teacher predictions, flattened)
    o_ref        : (1, 1) f32 VMEM (scalar loss)
    """
    # Identity mask used for diagonal extraction from the Gram matrix.
    row = lax.broadcasted_iota(jnp.int32, (n, n), 0)
    col = lax.broadcasted_iota(jnp.int32, (n, n), 1)
    eye = row == col

    def gram_diag_inv(p_ref):
        p = p_ref[...].astype(jnp.float32)                        # (n, d)
        if with_l2_norm:
            ssq = jnp.sum(p * p, axis=-1, keepdims=True)           # (n, 1)
            p = p / jnp.maximum(jnp.sqrt(ssq), eps)                # F.normalize
        # One big-K MXU matmul per input: (n, d) x (n, d)^T -> (n, n).
        g = lax.dot_general(p, p, (((1,), (1,)), ((), ())),
                            preferred_element_type=jnp.float32)
        gd = jnp.where(eye, g, 0.0)
        diag_col = jnp.sum(gd, axis=1, keepdims=True)              # (n, 1): G[i,i]
        diag_row = jnp.sum(gd, axis=0, keepdims=True)              # (1, n): G[j,j]
        nsq = (diag_col + diag_row) - 2.0 * g                      # ||p_i - p_j||^2
        # Inverse norm of each difference vector; exactly 0 for zero-length
        # differences (i == j), matching torch.F.normalize of a zero vector.
        inv = jnp.where(
            nsq > 0.0,
            1.0 / jnp.maximum(jnp.sqrt(jnp.maximum(nsq, 0.0)), eps),
            0.0)
        return g, diag_col, inv

    g_s, dg_s, inv_s = gram_diag_inv(s_ref)
    g_t, dg_t, inv_t = gram_diag_inv(t_ref)

    def angles(g, dg, inv):
        # angle[i, j, k] = (G[j,k] - G[i,j] - G[i,k] + G[i,i])
        #                   * inv[i,j] * inv[i,k]
        # (G and inv are symmetric, so no transposes are needed.)
        num = (g[None, :, :]          # G[j,k]   -> (1, n, n)
               - g[:, :, None]        # G[i,j]   -> (n, n, 1)
               - g[:, None, :]        # G[i,k]   -> (n, 1, n)
               + dg[:, :, None])      # G[i,i]   -> (n, 1, 1)
        return num * inv[:, :, None] * inv[:, None, :]

    d = angles(g_s, dg_s, inv_s) - angles(g_t, dg_t, inv_t)        # (n, n, n)
    ad = jnp.abs(d)
    sl1 = jnp.where(ad < beta, 0.5 * d * d / beta, ad - 0.5 * beta)

    tot = jnp.sum(sl1, axis=0)                                     # (n, n)
    tot = jnp.sum(tot, axis=(0, 1), keepdims=True)                 # (1, 1)
    o_ref[...] = tot * (loss_weight / float(n ** 3))


def angle_wise_rkd_loss(preds_S, preds_T, loss_weight=50.0, with_l2_norm=True):
    """Mirrors AngleWiseRKD.forward (loss_weight=50.0, with_l2_norm=True)."""
    n = preds_S.shape[0]
    s2 = preds_S.reshape(n, -1).astype(jnp.float32)   # == torch .view(N, -1)
    t2 = preds_T.reshape(n, -1).astype(jnp.float32)
    d = s2.shape[1]

    kernel = functools.partial(
        _angle_rkd_loss_kernel, n=n, loss_weight=float(loss_weight),
        with_l2_norm=bool(with_l2_norm), eps=1e-12, beta=1.0)

    out = pl.pallas_call(
        kernel,
        out_shape=jax.ShapeDtypeStruct((1, 1), jnp.float32),
        grid_spec=pltpu.PrefetchScalarGridSpec(
            num_scalar_prefetch=0,
            grid=(1,),                                  # single step: whole batch
            in_specs=[
                pl.BlockSpec((n, d), lambda i: (0, 0)),
                pl.BlockSpec((n, d), lambda i: (0, 0)),
            ],
            out_specs=pl.BlockSpec((1, 1), lambda i: (0, 0)),
        ),
        compiler_params=pltpu.CompilerParams(
            dimension_semantics=("arbitrary",)),
    )(s2, t2)

    return out[0, 0]


def _reference_loss(preds_S, preds_T, loss_weight=50.0, with_l2_norm=True,
                    eps=1e-12, beta=1.0):
    """Pure-JAX mirror of the PyTorch module (literal dataflow)."""
    def flatten_norm(p):
        p = p.reshape(p.shape[0], -1).astype(jnp.float32)
        if with_l2_norm:
            nrm = jnp.sqrt(jnp.sum(p * p, axis=-1, keepdims=True))
            p = p / jnp.maximum(nrm, eps)
        return p

    def angle(p):
        v = p[None, :, :] - p[:, None, :]                       # (N, N, D)
        nv = jnp.sqrt(jnp.sum(v * v, axis=-1, keepdims=True))
        v = v / jnp.maximum(nv, eps)
        return jnp.einsum('ijd,ikd->ijk', v, v).reshape(-1)

    a_s = angle(flatten_norm(preds_S))
    a_t = angle(flatten_norm(preds_T))
    d = a_s - a_t
    ad = jnp.abs(d)
    sl1 = jnp.where(ad < beta, 0.5 * d * d / beta, ad - 0.5 * beta)
    return jnp.mean(sl1) * loss_weight


if __name__ == "__main__":
    key = jax.random.PRNGKey(0)
    ks, kt = jax.random.split(key)

    # Small shapes consistent with the module: (N, C, H, W) predictions.
    N, C, H, W = 8, 4, 16, 16
    preds_S = jax.random.normal(ks, (N, C, H, W), dtype=jnp.float32)
    preds_T = jax.random.normal(kt, (N, C, H, W), dtype=jnp.float32)

    loss = angle_wise_rkd_loss(preds_S, preds_T)
    loss = jax.block_until_ready(loss)
    assert loss.shape == (), loss.shape
    assert bool(jnp.isfinite(loss)), float(loss)

    ref = _reference_loss(preds_S, preds_T)
    assert jnp.allclose(loss, ref, rtol=5e-3, atol=5e-4), (float(loss), float(ref))

    print("KERNEL_OK")
</pallas_src>

<mosaic_0001>
module attributes {stable_mosaic.version = 11 : i64} {
  func.func @_angle_rkd_loss_kernel(%arg0: i32, %arg1: memref<8x1024xf32, #tpu.memory_space<vmem>>, %arg2: memref<8x1024xf32, #tpu.memory_space<vmem>>, %arg3: memref<1x1xf32, #tpu.memory_space<vmem>>) attributes {dimension_semantics = [#tpu.dimension_semantics<arbitrary>], iteration_bounds = array<i64: 1>, scalar_prefetch = 0 : i64, scratch_operands = 0 : i64, tpu.core_type = #tpu.core_type<tc>, window_params = [{pipeline_mode = #tpu.pipeline_mode<synchronous>, transform_indices = @transform_0, window_bounds = array<i64: 8, 1024>}, {pipeline_mode = #tpu.pipeline_mode<synchronous>, transform_indices = @transform_1, window_bounds = array<i64: 8, 1024>}, {pipeline_mode = #tpu.pipeline_mode<synchronous>, transform_indices = @transform_2, window_bounds = array<i64: 1, 1>}]} {
    %0 = tpu.iota {dimensions = array<i32: 0>} : vector<8x8xi32>
    %1 = tpu.iota {dimensions = array<i32: 1>} : vector<8x8xi32>
    %2 = arith.cmpi eq, %0, %1 : vector<8x8xi32>
    %c0 = arith.constant 0 : index
    %c0_0 = arith.constant 0 : index
    %3 = vector.load %arg1[%c0, %c0_0] : memref<8x1024xf32, #tpu.memory_space<vmem>>, vector<8x1024xf32>
    %4 = arith.mulf %3, %3 : vector<8x1024xf32>
    %cst = arith.constant dense<0.000000e+00> : vector<8xf32>
    %5 = vector.multi_reduction <add>, %4, %cst [1] : vector<8x1024xf32> to vector<8xf32>
    %6 = vector.shape_cast %5 : vector<8xf32> to vector<8x1xf32>
    %7 = math.sqrt %6 : vector<8x1xf32>
    %cst_1 = arith.constant 9.99999996E-13 : f32
    %8 = vector.broadcast %cst_1 : f32 to vector<8x1xf32>
    %9 = arith.maximumf %7, %8 : vector<8x1xf32>
    %10 = vector.broadcast %9 : vector<8x1xf32> to vector<8x1024xf32>
    %11 = arith.divf %3, %10 : vector<8x1024xf32>
    %cst_2 = arith.constant dense<0.000000e+00> : vector<8x8xf32>
    %12 = tpu.matmul %11, %11, %cst_2 {dimension_numbers = #tpu.dot_dimension_numbers<[1], [1], [0], [0], [0, 0, 1, 0], [], []>} : vector<8x1024xf32>, vector<8x1024xf32>, vector<8x8xf32> -> vector<8x8xf32>
    %cst_3 = arith.constant 0.000000e+00 : f32
    %13 = vector.broadcast %cst_3 : f32 to vector<8x8xf32>
    %14 = arith.select %2, %12, %13 : vector<8x8xi1>, vector<8x8xf32>
    %cst_4 = arith.constant dense<0.000000e+00> : vector<8xf32>
    %15 = vector.multi_reduction <add>, %14, %cst_4 [1] : vector<8x8xf32> to vector<8xf32>
    %16 = vector.shape_cast %15 : vector<8xf32> to vector<8x1xf32>
    %cst_5 = arith.constant dense<0.000000e+00> : vector<8xf32>
    %17 = vector.multi_reduction <add>, %14, %cst_5 [0] : vector<8x8xf32> to vector<8xf32>
    %18 = vector.shape_cast %17 : vector<8xf32> to vector<1x8xf32>
    %19 = vector.broadcast %16 : vector<8x1xf32> to vector<8x8xf32>
    %20 = vector.broadcast %18 : vector<1x8xf32> to vector<8x8xf32>
    %21 = arith.addf %19, %20 : vector<8x8xf32>
    %cst_6 = arith.constant 2.000000e+00 : f32
    %22 = vector.broadcast %cst_6 : f32 to vector<8x8xf32>
    %23 = arith.mulf %22, %12 : vector<8x8xf32>
    %24 = arith.subf %21, %23 : vector<8x8xf32>
    %cst_7 = arith.constant 0.000000e+00 : f32
    %25 = vector.broadcast %cst_7 : f32 to vector<8x8xf32>
    %26 = arith.cmpf ogt, %24, %25 : vector<8x8xf32>
    %cst_8 = arith.constant 0.000000e+00 : f32
    %27 = vector.broadcast %cst_8 : f32 to vector<8x8xf32>
    %28 = arith.maximumf %24, %27 : vector<8x8xf32>
    %29 = math.sqrt %28 : vector<8x8xf32>
    %cst_9 = arith.constant 9.99999996E-13 : f32
    %30 = vector.broadcast %cst_9 : f32 to vector<8x8xf32>
    %31 = arith.maximumf %29, %30 : vector<8x8xf32>
    %cst_10 = arith.constant 1.000000e+00 : f32
    %32 = vector.broadcast %cst_10 : f32 to vector<8x8xf32>
    %33 = arith.divf %32, %31 : vector<8x8xf32>
    %cst_11 = arith.constant 0.000000e+00 : f32
    %34 = vector.broadcast %cst_11 : f32 to vector<8x8xf32>
    %35 = arith.select %26, %33, %34 : vector<8x8xi1>, vector<8x8xf32>
    %c0_12 = arith.constant 0 : index
    %c0_13 = arith.constant 0 : index
    %36 = vector.load %arg2[%c0_12, %c0_13] : memref<8x1024xf32, #tpu.memory_space<vmem>>, vector<8x1024xf32>
    %37 = arith.mulf %36, %36 : vector<8x1024xf32>
    %cst_14 = arith.constant dense<0.000000e+00> : vector<8xf32>
    %38 = vector.multi_reduction <add>, %37, %cst_14 [1] : vector<8x1024xf32> to vector<8xf32>
    %39 = vector.shape_cast %38 : vector<8xf32> to vector<8x1xf32>
    %40 = math.sqrt %39 : vector<8x1xf32>
    %cst_15 = arith.constant 9.99999996E-13 : f32
    %41 = vector.broadcast %cst_15 : f32 to vector<8x1xf32>
    %42 = arith.maximumf %40, %41 : vector<8x1xf32>
    %43 = vector.broadcast %42 : vector<8x1xf32> to vector<8x1024xf32>
    %44 = arith.divf %36, %43 : vector<8x1024xf32>
    %cst_16 = arith.constant dense<0.000000e+00> : vector<8x8xf32>
    %45 = tpu.matmul %44, %44, %cst_16 {dimension_numbers = #tpu.dot_dimension_numbers<[1], [1], [0], [0], [0, 0, 1, 0], [], []>} : vector<8x1024xf32>, vector<8x1024xf32>, vector<8x8xf32> -> vector<8x8xf32>
    %cst_17 = arith.constant 0.000000e+00 : f32
    %46 = vector.broadcast %cst_17 : f32 to vector<8x8xf32>
    %47 = arith.select %2, %45, %46 : vector<8x8xi1>, vector<8x8xf32>
    %cst_18 = arith.constant dense<0.000000e+00> : vector<8xf32>
    %48 = vector.multi_reduction <add>, %47, %cst_18 [1] : vector<8x8xf32> to vector<8xf32>
    %49 = vector.shape_cast %48 : vector<8xf32> to vector<8x1xf32>
    %cst_19 = arith.constant dense<0.000000e+00> : vector<8xf32>
    %50 = vector.multi_reduction <add>, %47, %cst_19 [0] : vector<8x8xf32> to vector<8xf32>
    %51 = vector.shape_cast %50 : vector<8xf32> to vector<1x8xf32>
    %52 = vector.broadcast %49 : vector<8x1xf32> to vector<8x8xf32>
    %53 = vector.broadcast %51 : vector<1x8xf32> to vector<8x8xf32>
    %54 = arith.addf %52, %53 : vector<8x8xf32>
    %cst_20 = arith.constant 2.000000e+00 : f32
    %55 = vector.broadcast %cst_20 : f32 to vector<8x8xf32>
    %56 = arith.mulf %55, %45 : vector<8x8xf32>
    %57 = arith.subf %54, %56 : vector<8x8xf32>
    %cst_21 = arith.constant 0.000000e+00 : f32
    %58 = vector.broadcast %cst_21 : f32 to vector<8x8xf32>
    %59 = arith.cmpf ogt, %57, %58 : vector<8x8xf32>
    %cst_22 = arith.constant 0.000000e+00 : f32
    %60 = vector.broadcast %cst_22 : f32 to vector<8x8xf32>
    %61 = arith.maximumf %57, %60 : vector<8x8xf32>
    %62 = math.sqrt %61 : vector<8x8xf32>
    %cst_23 = arith.constant 9.99999996E-13 : f32
    %63 = vector.broadcast %cst_23 : f32 to vector<8x8xf32>
    %64 = arith.maximumf %62, %63 : vector<8x8xf32>
    %cst_24 = arith.constant 1.000000e+00 : f32
    %65 = vector.broadcast %cst_24 : f32 to vector<8x8xf32>
    %66 = arith.divf %65, %64 : vector<8x8xf32>
    %cst_25 = arith.constant 0.000000e+00 : f32
    %67 = vector.broadcast %cst_25 : f32 to vector<8x8xf32>
    %68 = arith.select %59, %66, %67 : vector<8x8xi1>, vector<8x8xf32>
    %69 = vector.shape_cast %12 : vector<8x8xf32> to vector<1x8x8xf32>
    %70 = vector.shape_cast %12 : vector<8x8xf32> to vector<8x8x1xf32>
    %71 = vector.broadcast %69 : vector<1x8x8xf32> to vector<8x8x8xf32>
    %72 = vector.broadcast %70 : vector<8x8x1xf32> to vector<8x8x8xf32>
    %73 = arith.subf %71, %72 : vector<8x8x8xf32>
    %74 = vector.shape_cast %12 : vector<8x8xf32> to vector<8x1x8xf32>
    %75 = vector.broadcast %74 : vector<8x1x8xf32> to vector<8x8x8xf32>
    %76 = arith.subf %73, %75 : vector<8x8x8xf32>
    %77 = vector.shape_cast %16 : vector<8x1xf32> to vector<8x1x1xf32>
    %78 = vector.broadcast %77 : vector<8x1x1xf32> to vector<8x8x8xf32>
    %79 = arith.addf %76, %78 : vector<8x8x8xf32>
    %80 = vector.shape_cast %35 : vector<8x8xf32> to vector<8x8x1xf32>
    %81 = vector.broadcast %80 : vector<8x8x1xf32> to vector<8x8x8xf32>
    %82 = arith.mulf %79, %81 : vector<8x8x8xf32>
    %83 = vector.shape_cast %35 : vector<8x8xf32> to vector<8x1x8xf32>
    %84 = vector.broadcast %83 : vector<8x1x8xf32> to vector<8x8x8xf32>
    %85 = arith.mulf %82, %84 : vector<8x8x8xf32>
    %86 = vector.shape_cast %45 : vector<8x8xf32> to vector<1x8x8xf32>
    %87 = vector.shape_cast %45 : vector<8x8xf32> to vector<8x8x1xf32>
    %88 = vector.broadcast %86 : vector<1x8x8xf32> to vector<8x8x8xf32>
    %89 = vector.broadcast %87 : vector<8x8x1xf32> to vector<8x8x8xf32>
    %90 = arith.subf %88, %89 : vector<8x8x8xf32>
    %91 = vector.shape_cast %45 : vector<8x8xf32> to vector<8x1x8xf32>
    %92 = vector.broadcast %91 : vector<8x1x8xf32> to vector<8x8x8xf32>
    %93 = arith.subf %90, %92 : vector<8x8x8xf32>
    %94 = vector.shape_cast %49 : vector<8x1xf32> to vector<8x1x1xf32>
    %95 = vector.broadcast %94 : vector<8x1x1xf32> to vector<8x8x8xf32>
    %96 = arith.addf %93, %95 : vector<8x8x8xf32>
    %97 = vector.shape_cast %68 : vector<8x8xf32> to vector<8x8x1xf32>
    %98 = vector.broadcast %97 : vector<8x8x1xf32> to vector<8x8x8xf32>
    %99 = arith.mulf %96, %98 : vector<8x8x8xf32>
    %100 = vector.shape_cast %68 : vector<8x8xf32> to vector<8x1x8xf32>
    %101 = vector.broadcast %100 : vector<8x1x8xf32> to vector<8x8x8xf32>
    %102 = arith.mulf %99, %101 : vector<8x8x8xf32>
    %103 = arith.subf %85, %102 : vector<8x8x8xf32>
    %104 = math.absf %103 : vector<8x8x8xf32>
    %cst_26 = arith.constant 1.000000e+00 : f32
    %105 = vector.broadcast %cst_26 : f32 to vector<8x8x8xf32>
    %106 = arith.cmpf olt, %104, %105 : vector<8x8x8xf32>
    %cst_27 = arith.constant 5.000000e-01 : f32
    %107 = vector.broadcast %cst_27 : f32 to vector<8x8x8xf32>
    %108 = arith.mulf %107, %103 : vector<8x8x8xf32>
    %109 = arith.mulf %108, %103 : vector<8x8x8xf32>
    %cst_28 = arith.constant 1.000000e+00 : f32
    %110 = vector.broadcast %cst_28 : f32 to vector<8x8x8xf32>
    %111 = arith.divf %109, %110 : vector<8x8x8xf32>
    %cst_29 = arith.constant 5.000000e-01 : f32
    %112 = vector.broadcast %cst_29 : f32 to vector<8x8x8xf32>
    %113 = arith.subf %104, %112 : vector<8x8x8xf32>
    %114 = arith.select %106, %111, %113 : vector<8x8x8xi1>, vector<8x8x8xf32>
    %cst_30 = arith.constant dense<0.000000e+00> : vector<8x8xf32>
    %115 = vector.multi_reduction <add>, %114, %cst_30 [0] : vector<8x8x8xf32> to vector<8x8xf32>
    %116 = vector.shape_cast %115 : vector<8x8xf32> to vector<1x8x8xf32>
    %cst_31 = arith.constant dense<0.000000e+00> : vector<1xf32>
    %117 = vector.multi_reduction <add>, %116, %cst_31 [1, 2] : vector<1x8x8xf32> to vector<1xf32>
    %118 = vector.shape_cast %117 : vector<1xf32> to vector<1x1x1xf32>
    %119 = vector.extract %118[0, 0, 0] : f32 from vector<1x1x1xf32>
    %120 = vector.broadcast %119 : f32 to vector<1x1xf32>
    %cst_32 = arith.constant 0.09765625 : f32
    %121 = vector.broadcast %cst_32 : f32 to vector<1x1xf32>
    %122 = arith.mulf %120, %121 : vector<1x1xf32>
    %c0_33 = arith.constant 0 : index
    %c0_34 = arith.constant 0 : index
    %123 = vector.load %arg3[%c0_33, %c0_34] : memref<1x1xf32, #tpu.memory_space<vmem>>, vector<1x1xf32>
    tpu.vector_store %arg3[%c0_33, %c0_34], %122 {strides = array<i32>} : memref<1x1xf32, #tpu.memory_space<vmem>>, vector<1x1xf32>,
    return
  }
  func.func @transform_0(%arg0: i32) -> (i32, i32) {
    %c0_i32 = arith.constant 0 : i32
    %c0_i32_0 = arith.constant 0 : i32
    %c0_i32_1 = arith.constant 0 : i32
    return %c0_i32, %c0_i32_0 : i32, i32
  }
  func.func @transform_1(%arg0: i32) -> (i32, i32) {
    %c0_i32 = arith.constant 0 : i32
    %c0_i32_0 = arith.constant 0 : i32
    %c0_i32_1 = arith.constant 0 : i32
    return %c0_i32, %c0_i32_0 : i32, i32
  }
  func.func @transform_2(%arg0: i32) -> (i32, i32) {
    %c0_i32 = arith.constant 0 : i32
    %c0_i32_0 = arith.constant 0 : i32
    %c0_i32_1 = arith.constant 0 : i32
    return %c0_i32, %c0_i32_0 : i32, i32
  }
}

</mosaic_0001>

<bundles_post_ra>
// kernel: tpu_custom_call.1
= control target key start
LH: loop header
LB: loop body
LE: loop exit
PB: predicated region body
PF: predicated region fallthrough
CT: control target
= control target key end

     0   :  { %7 = vsyncpa [#allocation3], 0  ;;  %s2176_s0 = inlined_call_operand.hbm [shape: f32[8,1024], index: 0, kind: input, shape index: {}]   ;;  %s2177_s1 = inlined_call_operand.hbm [shape: f32[8,1024], index: 1, kind: input, shape index: {}]   ;;  %s2178_s2 = inlined_call_operand.hbm [shape: f32[1,1], index: 2, kind: output, shape index: {}]  }
   0x1   :  { %8 = vsyncpa [#allocation6], 0 }
   0x2   :  { %9 = vsyncpa [#allocation4], 0  ;;  %s1699_s9 = smov [#allocation2]   ;;  %s1700_s11 = smov [#allocation5]  }
   0x3   :  { %s16_s10 = sshll.u32 %s1699_s9, 4  ;;  %s26_s12 = sshll.u32 %s1700_s11, 4  ;;  %s17_s10 = int_to_ptr.vmem [resolvable:$true] %s16_s10  ;;  %s27_s12 = int_to_ptr.vmem [resolvable:$true] %s26_s12 }
   0x4   :  { %s1627_s15 = scalar_lea.hbm %s2176_s0, 1024 }
   0x5   :  { %p1628_p0 = scmp.ne.s32.totalorder %s2176_s0, %s1627_s15  ;;  %p1631_p1 = scmp.lt.u32.totalorder %s1627_s15, %s2176_s0 }
   0x7   :  { %p1633_p2 = pnand %p1631_p1, %p1628_p0 }
   0x9   :  { %1636 = shalt.err (!%p1633_p2)
}
   0xa   :  { %s1637_s20 = scalar_lea.vmem %s17_s10, 1024  ;;  %p1642_p4 = scmp.lt.s32.totalorder %s17_s10, %s17_s10 }
   0xb   :  { %p1638_p3 = scmp.ne.s32.totalorder %s17_s10, %s1637_s20  ;;  %p1643_p5 = scmp.lt.s32.totalorder %s1637_s20, %s1637_s20 }
   0xd   :  { %p1644_p6 = por %p1643_p5, %p1642_p4 }
   0xf   :  { %p1645_p7 = pnand %p1644_p6, %p1638_p3 }
  0x11   :  { %1648 = shalt.err (!%p1645_p7)
}
  0x12   :  { %19 = dma.hbm_to_vmem [thread:$0]  %s2176_s0, 1024, %s17_s10, [#allocation3]  }
  0x13   :  { %s1649_s25 = scalar_lea.hbm %s2177_s1, 1024 }
  0x14   :  { %p1650_p8 = scmp.ne.s32.totalorder %s2177_s1, %s1649_s25  ;;  %p1653_p9 = scmp.lt.u32.totalorder %s1649_s25, %s2177_s1 }
  0x16   :  { %p1655_p10 = pnand %p1653_p9, %p1650_p8 }
  0x18   :  { %1658 = shalt.err (!%p1655_p10)
}
  0x19   :  { %s1659_s30 = scalar_lea.vmem %s27_s12, 1024  ;;  %p1664_p12 = scmp.lt.s32.totalorder %s27_s12, %s27_s12 }
  0x1a   :  { %p1660_p11 = scmp.ne.s32.totalorder %s27_s12, %s1659_s30  ;;  %p1665_p13 = scmp.lt.s32.totalorder %s1659_s30, %s1659_s30 }
  0x1c   :  { %p1666_p0 = por %p1665_p13, %p1664_p12 }
  0x1e   :  { %p1667_p1 = pnand %p1666_p0, %p1660_p11 }
  0x20   :  { %1670 = shalt.err (!%p1667_p1)
}
  0x21   :  { %29 = dma.hbm_to_vmem [thread:$0]  %s2177_s1, 1024, %s27_s12, [#allocation6]  }
  0x22   :  { %1693 = dma.done.wait [#allocation3], 1024  }
  0x23   :  { %1694 = vsyncadd [#allocation3], 4294966272 }
  0x24   :  { %1695 = dma.done.wait [#allocation6], 1024  }
  0x25   :  { %1696 = vsyncadd [#allocation6], 4294966272  ;;  %v1742_v0 = vld [vmem:[#allocation2] sm:$0xff]  ;;  %v1744_v1 = vld [vmem:[#allocation2 + $0x8] sm:$0xff]  ;;  %vm364_vm5 = vcmask 64512   ;;  %s1702_s1 = smov [#allocation7]  }
  0x26   :  { %v1746_v2 = vld [vmem:[#allocation2 + $0x10] sm:$0xff]  ;;  %v1748_v3 = vld [vmem:[#allocation2 + $0x18] sm:$0xff]  ;;  %v49_v4 = vmul.f32 %v1742_v0, %v1742_v0  ;;  %v50_v5 = vmul.f32 %v1744_v1, %v1744_v1  ;;  %v1756_v7 = vld [vmem:[#allocation2 + $0x20] sm:$0xff]  ;;  %s1575_s4 = sshll.u32 %s1702_s1, 4  ;;  %s1576_s4 = int_to_ptr.vmem [resolvable:$true] %s1575_s4 }
  0x27   :  { %v51_v6 = vmul.f32 %v1746_v2, %v1746_v2  ;;  %v1758_v8 = vld [vmem:[#allocation5] sm:$0xff]  ;;  %v52_v9 = vmul.f32 %v1748_v3, %v1748_v3  ;;  %v1762_v11 = vld [vmem:[#allocation5 + $0x8] sm:$0xff]  ;;  %v1764_v12 = vld [vmem:[#allocation5 + $0x10] sm:$0xff]  ;;  %v53_v18 = vmul.f32 %v1756_v7, %v1756_v7  ;;  %s1671_s6 = scalar_lea.vmem %s1576_s4, 16  ;;  %s1675_s7 = scalar_lea.vmem %s1576_s4, 32 }
  0x28   :  { %v57_v10 = vadd.f32 %v50_v5, %v49_v4  ;;  %v1766_v13 = vld [vmem:[#allocation5 + $0x18] sm:$0xff]  ;;  %v398_v14 = vmul.f32 %v1758_v8, %v1758_v8  ;;  %v1770_v15 = vld [vmem:[#allocation2 + $0x28] sm:$0xff]  ;;  %v399_v16 = vmul.f32 %v1762_v11, %v1762_v11  ;;  %v400_v17 = vmul.f32 %v1764_v12, %v1764_v12  ;;  %v1778_v20 = vld [vmem:[#allocation5 + $0x20] sm:$0xff]  ;;  %p1672_p2 = scmp.ne.s32.totalorder %s1576_s4, %s1671_s6  ;;  %p1676_p3 = scmp.lt.s32.totalorder %s1576_s4, %s1576_s4 }
  0x29   :  { %v1780_v21 = vld [vmem:[#allocation2 + $0x30] sm:$0xff]  ;;  %v401_v22 = vmul.f32 %v1766_v13, %v1766_v13  ;;  %v54_v24 = vmul.f32 %v1770_v15, %v1770_v15  ;;  %v1786_v26 = vld [vmem:[#allocation5 + $0x28] sm:$0xff]  ;;  %v1788_v27 = vld [vmem:[#allocation2 + $0x38] sm:$0xff]  ;;  %v402_v28 = vmul.f32 %v1778_v20, %v1778_v20  ;;  %p1677_p4 = scmp.lt.s32.totalorder %s1675_s7, %s1671_s6 }
  0x2a   :  { %v58_v19 = vadd.f32 %v57_v10, %v51_v6  ;;  %v406_v23 = vadd.f32 %v399_v16, %v398_v14  ;;  %v55_v30 = vmul.f32 %v1780_v21, %v1780_v21  ;;  %v1794_v32 = vld [vmem:[#allocation5 + $0x30] sm:$0xff]  ;;  %v403_v33 = vmul.f32 %v1786_v26, %v1786_v26  ;;  %v1800_v37 = vld [vmem:[#allocation5 + $0x38] sm:$0xff] }
  0x2b   :  { %v56_v35 = vmul.f32 %v1788_v27, %v1788_v27  ;;  %v404_v38 = vmul.f32 %v1794_v32, %v1794_v32  ;;  %v405_v41 = vmul.f32 %v1800_v37, %v1800_v37  ;;  %v36_v14 = vlaneseq  ;;  %p1678_p5 = por %p1677_p4, %p1676_p3 }
  0x2c   :  { %v59_v25 = vadd.f32 %v58_v19, %v52_v9  ;;  %v407_v29 = vadd.f32 %v406_v23, %v400_v17 }
  0x2d   :  { %v37_v17 = vshrl.u32 %v36_v14, 7  ;;  %p1679_p6 = pnand %p1678_p5, %p1672_p2 }
  0x2e   :  { %v60_v31 = vadd.f32 %v59_v25, %v53_v18  ;;  %v408_v34 = vadd.f32 %v407_v29, %v401_v22  ;;  %v39_v18 = vand.u32 127, %v36_v14 }
  0x30   :  { %v61_v36 = vadd.f32 %v60_v31, %v54_v24  ;;  %v409_v39 = vadd.f32 %v408_v34, %v402_v28  ;;  %vm40_vm4 = vcmp.eq.s32.totalorder %v37_v17, %v39_v18  ;;  %v1844_v31 = vsub.s32 3, %v37_v17 }
  0x32   :  { %v62_v40 = vadd.f32 %v61_v36, %v55_v30  ;;  %v410_v42 = vadd.f32 %v409_v39, %v403_v33  ;;  %v1857_v39 = vsub.s32 4, %v37_v17 }
  0x34   :  { %v63_v43 = vadd.f32 %v62_v40, %v56_v35  ;;  %v411_v44 = vadd.f32 %v410_v42, %v404_v38 }
  0x36   :  { %64 = vadd.xlane.f32.xlu0 %v63_v43  ;;  %v412_v45 = vadd.f32 %v411_v44, %v405_v41 }
  0x3a   :  { %413 = vadd.xlane.f32.xlu0 %v412_v45 }
  0xc3   :  { %v65_v46 = vpop.xlane.xlu0 %64 }
  0xc4   :  { %1611 = vrsqrt.f32 %v65_v46  ;;  %vm68_vm0 = vcmp.eq.f32.partialorder %v65_v46, inf  ;;  %v71_v50 = vand.u32 2147483648, %v65_v46  ;;  %vm70_vm1 = vcmp.eq.f32.partialorder %v65_v46, 0.0 }
  0xc7   :  { %v414_v47 = vpop.xlane.xlu0 %413 }
  0xc8   :  { %1613 = vrsqrt.f32 %v414_v47  ;;  %vm417_vm2 = vcmp.eq.f32.partialorder %v414_v47, inf  ;;  %v420_v56 = vand.u32 2147483648, %v414_v47  ;;  %vm419_vm3 = vcmp.eq.f32.partialorder %v414_v47, 0.0 }
  0xce   :  { %v1612_v48 = vpop.eup %1611 }
  0xcf   :  { %v67_v49 = vmul.f32 %v1612_v48, %v65_v46 }
  0xd1   :  { %v69_v51 = vsel %vm68_vm0, %v65_v46, %v67_v49 }
  0xd2   :  { %v1614_v52 = vpop.eup %1613  ;;  %v72_v53 = vsel %vm70_vm1, %v71_v50, %v69_v51 }
  0xd3   :  { %v73_v54 = vmax.f32 %v72_v53, 1e-12  ;;  %v416_v55 = vmul.f32 %v1614_v52, %v414_v47 }
  0xd5   :  { %1615 = vrcp.f32 %v73_v54  ;;  %v418_v57 = vsel %vm417_vm2, %v414_v47, %v416_v55  ;;  %v1871_v47 = vsub.s32 5, %v37_v17 }
  0xd6   :  { %v421_v58 = vsel %vm419_vm3, %v420_v56, %v418_v57  ;;  %v1892_v57 = vsub.s32 1, %v37_v17 }
  0xd7   :  { %v422_v59 = vmax.f32 %v421_v58, 1e-12 }
  0xd9   :  { %1617 = vrcp.f32 %v422_v59  ;;  %v1896_v59 = vsub.s32 6, %v37_v17 }
  0xdf   :  { %v1616_v60 = vpop.eup %1615 }
  0xe0   :  { %v76_v61 = vmul.f32 %v1616_v60, %v1744_v1  ;;  %v75_v62 = vmul.f32 %v1616_v60, %v1742_v0  ;;  %v78_v63 = vmul.f32 %v1616_v60, %v1748_v3  ;;  %v77_v9 = vmul.f32 %v1616_v60, %v1746_v2 }
  0xe1   :  { %v80_v1 = vmul.f32 %v1616_v60, %v1770_v15  ;;  %v79_v2 = vmul.f32 %v1616_v60, %v1756_v7  ;;  %v1701_v15 = vmov 1966171168  }
  0xe2   :  { %83 = vmatprep.subr.mxu0 %v76_v61  ;;  %147 = vmatprep.mubr.f32.mxu0 %v76_v61  ;;  %v805_v16 = vunpack.c.l.s4 %v1701_v15 }
  0xe3   :  { %v1618_v4 = vpop.eup %1617  ;;  %84 = vmatpush1.xpose.msra.mxu0 %v75_v62 }
  0xe4   :  { %153 = vmatprep.subr.mxu0 %v78_v63  ;;  %v425_v5 = vmul.f32 %v1618_v4, %v1762_v11  ;;  %v424_v6 = vmul.f32 %v1618_v4, %v1758_v8  ;;  %v427_v0 = vmul.f32 %v1618_v4, %v1766_v13  ;;  %v426_v3 = vmul.f32 %v1618_v4, %v1764_v12 }
  0xe5   :  { %v429_v10 = vmul.f32 %v1618_v4, %v1786_v26  ;;  %v82_v8 = vmul.f32 %v1616_v60, %v1788_v27  ;;  %v428_v11 = vmul.f32 %v1618_v4, %v1778_v20  ;;  %v431_v13 = vmul.f32 %v1618_v4, %v1800_v37 }
  0xe6   :  { %148 = vmatmul.mubr.f32.vlgmr.msra.gmra.mrb[0].mxu0 %v75_v62  ;;  %432 = vmatprep.subr.mxu1 %v425_v5  ;;  %v81_v12 = vmul.f32 %v1616_v60, %v1780_v21  ;;  %v430_v7 = vmul.f32 %v1618_v4, %v1794_v32  ;;  %v806_v19 = vunpack.c.0.s8 %v805_v16  ;;  %v1822_v20 = vsub.s32 0, %v37_v17 }
  0xe7   :  { %496 = vmatprep.mubr.f32.mxu1 %v425_v5  ;;  %154 = vmatpush1.xpose.msra.mxu0 %v77_v9  ;;  %v1832_v26 = vsub.s32 2, %v37_v17  ;;  %v1906_v4 = vsub.s32 7, %v37_v17 }
  0xe8   :  { %217 = vmatprep.mubr.f32.mxu0 %v78_v63  ;;  %433 = vmatpush1.xpose.msra.mxu1 %v424_v6  ;;  %v1824_v21 = vsub.s32 %v806_v19, %v37_v17 }
  0xe9   :  { %223 = vmatprep.subr.mxu0 %v80_v1  ;;  %502 = vmatprep.subr.mxu1 %v427_v0 }
  0xeb   :  { %497 = vmatmul.mubr.f32.vlgmr.msra.gmra.mrb[0].mxu1 %v424_v6 }
  0xec   :  { %503 = vmatpush1.xpose.msra.mxu1 %v426_v3  ;;  %566 = vmatprep.mubr.f32.mxu1 %v427_v0 }
  0xed   :  { %572 = vmatprep.subr.mxu1 %v429_v10 }
  0xee   :  { %218 = vmatmul.mubr.f32.vlgmr.msra.gmra.mrb[0].mxu0 %v77_v9 }
  0xef   :  { %224 = vmatpush1.xpose.msra.mxu0 %v79_v2  ;;  %287 = vmatprep.mubr.f32.mxu0 %v80_v1 }
  0xf0   :  { %293 = vmatprep.subr.mxu0 %v82_v8 }
  0xf3   :  { %567 = vmatmul.mubr.f32.vlgmr.msra.gmra.mrb[0].mxu1 %v426_v3 }
  0xf4   :  { %573 = vmatpush1.xpose.msra.mxu1 %v428_v11  ;;  %636 = vmatprep.mubr.f32.mxu1 %v429_v10 }
  0xf5   :  { %642 = vmatprep.subr.mxu1 %v431_v13 }
  0xf6   :  { %288 = vmatmul.mubr.f32.vlgmr.msra.gmra.mrb[0].mxu0 %v79_v2 }
  0xf7   :  { %294 = vmatpush1.xpose.msra.mxu0 %v81_v12  ;;  %357 = vmatprep.mubr.f32.mxu0 %v82_v8 }
  0xfb   :  { %637 = vmatmul.mubr.f32.vlgmr.msra.gmra.mrb[0].mxu1 %v428_v11 }
  0xfc   :  { %643 = vmatpush1.xpose.msra.mxu1 %v430_v7  ;;  %706 = vmatprep.mubr.f32.mxu1 %v431_v13 }
  0xfe   :  { %358 = vmatmul.mubr.f32.vlgmr.msra.gmra.mrb[0].mxu0 %v81_v12 }
 0x103   :  { %707 = vmatmul.mubr.f32.vlgmr.msra.gmra.mrb[0].mxu1 %v430_v7 }
 0x1d1   :  { %v1826_v22 = vpop.f32.mrb[0].mxu0 }
 0x1d2   :  { %v361_v23 = vpop.f32.mrb[1].mxu0  ;;  %v741_v24 = vrot.slane %v1826_v22, %v1822_v20  ;;  %v363_v25 = vsel %vm40_vm4, %v1826_v22, 0.0  ;;  %v810_v28 = vrot.slane %v1826_v22, %v1824_v21  ;;  %v755_v30 = vrot.slane %v1826_v22, %v1832_v26 }
 0x1d3   :  { %v1835_v27 = vsel %vm364_vm5, %v363_v25, 0.0  ;;  %v803_v36 = vcombine.high %v1826_v22, %v1826_v22  ;;  %v762_v38 = vrot.slane %v1826_v22, %v1844_v31  ;;  %v769_v46 = vrot.slane %v1826_v22, %v1857_v39 }
 0x1d4   :  { %743 = vbcast.lane.b32.xlu0 %v741_v24, 256  ;;  %366 = vadd.xlane.f32.xlu1 %v1835_v27  ;;  %v826_v32 = vrot.slane %v810_v28, %v1824_v21  ;;  %v818_v33 = vcombine.high %v810_v28, %v810_v28  ;;  %v776_v55 = vrot.slane %v1826_v22, %v1871_v47  ;;  %v368_v16 = vrot.slane %v1835_v27, 4 }
 0x1d5   :  { %v817_v41 = vrot.slane %v803_v36, %v1824_v21  ;;  %v748_v60 = vrot.slane %v1826_v22, %v1892_v57  ;;  %v783_v61 = vrot.slane %v1826_v22, %v1896_v59  ;;  %v790_v6 = vrot.slane %v1826_v22, %v1906_v4 }
 0x1d6   :  { %v1840_v29 = vpop.f32.mrb[0].mxu1  ;;  %v1860_v40 = vrot.slane %v818_v33, %v1824_v21  ;;  %v855_v2 = vrot.slane %v826_v32, %v1822_v20  ;;  %v848_v11 = vcombine.high %v826_v32, %v826_v32  ;;  %v369_v24 = vadd.f32 %v368_v16, %v1835_v27 }
 0x1d7   :  { %v710_v34 = vpop.f32.mrb[1].mxu1  ;;  %v712_v35 = vsel %vm40_vm4, %v1840_v29, 0.0  ;;  %v1176_v42 = vcombine.high %v1840_v29, %v1840_v29  ;;  %v1866_v43 = vrot.slane %v817_v41, %v1824_v21  ;;  %v819_v44 = vcombine.high %v817_v41, %v817_v41 }
 0x1d8   :  { %757 = vbcast.lane.b32.xlu0 %v755_v30, 256  ;;  %v1852_v37 = vsel %vm364_vm5, %v712_v35, 0.0  ;;  %v1183_v48 = vrot.slane %v1840_v29, %v1824_v21  ;;  %v1149_v58 = vrot.slane %v1840_v29, %v1871_v47  ;;  %v1114_v62 = vrot.slane %v1840_v29, %v1822_v20 }
 0x1d9   :  { %714 = vadd.xlane.f32.xlu1 %v1852_v37  ;;  %v1190_v45 = vrot.slane %v1176_v42, %v1824_v21  ;;  %v1876_v49 = vrot.slane %v819_v44, %v1824_v21  ;;  %v1156_v63 = vrot.slane %v1840_v29, %v1896_v59  ;;  %v1121_v5 = vrot.slane %v1840_v29, %v1892_v57 }
 0x1da   :  { %v1882_v52 = vrot.slane %v1183_v48, %v1824_v21  ;;  %v1191_v53 = vcombine.high %v1183_v48, %v1183_v48  ;;  %v1128_v9 = vrot.slane %v1840_v29, %v1832_v26  ;;  %v1163_v1 = vrot.slane %v1840_v29, %v1906_v4 }
 0x1db   :  { %v1192_v50 = vcombine.high %v1190_v45, %v1190_v45  ;;  %v1879_v51 = vrot.slane %v1190_v45, %v1824_v21  ;;  %v1135_v0 = vrot.slane %v1840_v29, %v1844_v31  ;;  %v1142_v3 = vrot.slane %v1840_v29, %v1857_v39 }
 0x1dc   :  { %764 = vbcast.lane.b32.xlu0 %v762_v38, 256  ;;  %v1890_v56 = vrot.slane %v1191_v53, %v1824_v21  ;;  %v863_v7 = vrot.slane %v848_v11, %v1822_v20  ;;  %v850_v15 = vcombine.high %v1860_v40, %v1860_v40  ;;  %v716_v25 = vrot.slane %v1852_v37, 4 }
 0x1dd   :  { %v1885_v54 = vrot.slane %v1192_v50, %v1824_v21  ;;  %v871_v32 = vrot.slane %v1866_v43, %v1822_v20  ;;  %v370_v34 = vrot.slane %v369_v24, 2  ;;  %v875_v41 = vrot.slane %v1876_v49, %v1822_v20 }
 0x1de   :  { %v867_v19 = vrot.slane %v850_v15, %v1822_v20  ;;  %v717_v35 = vadd.f32 %v716_v25, %v1852_v37  ;;  %v849_v53 = vcombine.high %v1866_v43, %v1866_v43  ;;  %v851_v43 = vcombine.high %v1876_v49, %v1876_v49 }
 0x1df   :  { %v371_v27 = vadd.f32 %v370_v34, %v369_v24  ;;  %v1248_v48 = vrot.slane %v1885_v54, %v1822_v20  ;;  %vm1567_vm4 = vcmask 0  }
 0x1e0   :  { %771 = vbcast.lane.b32.xlu0 %v769_v46, 256  ;;  %v718_v44 = vrot.slane %v717_v35, 2 }
 0x1e1   :  { %v372_v37 = vrot.slane %v371_v27, 1 }
 0x1e4   :  { %778 = vbcast.lane.b32.xlu0 %v776_v55, 256  ;;  %v719_v55 = vadd.f32 %v718_v44, %v717_v35  ;;  %v859_v44 = vrot.slane %v1860_v40, %v1822_v20 }
 0x1e8   :  { %1151 = vbcast.lane.b32.xlu0 %v1149_v58, 256 }
 0x1ea   :  { %750 = vbcast.lane.b32.xlu1 %v748_v60, 256 }
 0x1ec   :  { %785 = vbcast.lane.b32.xlu0 %v783_v61, 256  ;;  %v1222_v61 = vcombine.high %v1879_v51, %v1879_v51 }
 0x1ee   :  { %1116 = vbcast.lane.b32.xlu1 %v1114_v62, 256  ;;  %v879_v62 = vrot.slane %v849_v53, %v1822_v20 }
 0x1f0   :  { %1158 = vbcast.lane.b32.xlu0 %v1156_v63, 256 }
 0x1f2   :  { %1123 = vbcast.lane.b32.xlu1 %v1121_v5, 256  ;;  %v373_v5 = vadd.f32 %v372_v37, %v371_v27 }
 0x1f4   :  { %792 = vbcast.lane.b32.xlu0 %v790_v6, 256  ;;  %v720_v6 = vrot.slane %v719_v55, 1 }
 0x1f6   :  { %1130 = vbcast.lane.b32.xlu1 %v1128_v9, 256  ;;  %v721_v16 = vadd.f32 %v720_v6, %v719_v55 }
 0x1f8   :  { %1165 = vbcast.lane.b32.xlu0 %v1163_v1, 256  ;;  %v375_v1 = vmul.f32 2.0, %v1826_v22 }
 0x1fa   :  { %1137 = vbcast.lane.b32.xlu1 %v1135_v0, 256 }
 0x1fe   :  { %1144 = vbcast.lane.b32.xlu1 %v1142_v3, 256 }
 0x246   :  { %v744_v10 = vpop.permute.xlu0 %743 }
 0x247   :  { %v794_v8 = vsub.f32 %v1826_v22, %v744_v10  ;;  %v1252_v10 = vrot.slane %v1222_v61, %v1822_v20 }
 0x249   :  { %v892_v13 = vsub.f32 %v794_v8, %v855_v2 }
 0x24a   :  { %v758_v12 = vpop.permute.xlu0 %757 }
 0x24b   :  { %v796_v14 = vsub.f32 %v1826_v22, %v758_v12 }
 0x24d   :  { %v894_v17 = vsub.f32 %v796_v14, %v863_v7 }
 0x24e   :  { %v765_v18 = vpop.permute.xlu0 %764 }
 0x24f   :  { %v797_v23 = vsub.f32 %v1826_v22, %v765_v18 }
 0x251   :  { %v895_v28 = vsub.f32 %v797_v23, %v867_v19 }
 0x252   :  { %v772_v30 = vpop.permute.xlu0 %771 }
 0x253   :  { %v798_v33 = vsub.f32 %v1826_v22, %v772_v30 }
 0x255   :  { %v896_v36 = vsub.f32 %v798_v33, %v871_v32  ;;  %v723_v33 = vmul.f32 2.0, %v1840_v29 }
 0x256   :  { %v779_v38 = vpop.permute.xlu0 %778 }
 0x257   :  { %v799_v42 = vsub.f32 %v1826_v22, %v779_v38 }
 0x259   :  { %v897_v45 = vsub.f32 %v799_v42, %v875_v41  ;;  %v1224_v42 = vcombine.high %v1885_v54, %v1885_v54 }
 0x25a   :  { %v1152_v46 = vpop.permute.xlu0 %1151 }
 0x25b   :  { %v1172_v50 = vsub.f32 %v1840_v29, %v1152_v46 }
 0x25d   :  { %v1270_v58 = vsub.f32 %v1172_v50, %v1248_v48 }
 0x25e   :  { %v786_v60 = vpop.permute.xlu0 %785 }
 0x25f   :  { %v800_v63 = vsub.f32 %v1826_v22, %v786_v60  ;;  %v1256_v60 = vrot.slane %v1224_v42, %v1822_v20 }
 0x261   :  { %v898_v9 = vsub.f32 %v800_v63, %v879_v62  ;;  %v367_v0 = vpop.xlane.xlu1 %366 }
 0x262   :  { %v374_v3 = vadd.f32 %v373_v5, %v367_v0  ;;  %v1159_v2 = vpop.permute.xlu0 %1158  ;;  %v904_v8 = vrot.slane %v367_v0, %v1822_v20  ;;  %v912_v11 = vrot.slane %v367_v0, %v1832_v26  ;;  %v924_v7 = vrot.slane %v367_v0, %v1871_v47 }
 0x263   :  { %v1173_v12 = vsub.f32 %v1840_v29, %v1159_v2  ;;  %v928_v14 = vrot.slane %v367_v0, %v1896_v59  ;;  %v916_v15 = vrot.slane %v367_v0, %v1844_v31  ;;  %v920_v38 = vrot.slane %v367_v0, %v1857_v39 }
 0x264   :  { %v1957_v18 = vsub.f32 %v374_v3, %v375_v1  ;;  %v1959_v49 = vadd.f32 %v904_v8, %v892_v13  ;;  %v1961_v19 = vadd.f32 %v912_v11, %v894_v17  ;;  %v1963_v24 = vadd.f32 %v924_v7, %v897_v45 }
 0x265   :  { %v1271_v23 = vsub.f32 %v1173_v12, %v1252_v10  ;;  %v1965_v25 = vadd.f32 %v928_v14, %v898_v9  ;;  %v1967_v30 = vadd.f32 %v916_v15, %v895_v28  ;;  %v883_v17 = vrot.slane %v851_v43, %v1822_v20 }
 0x266   :  { %v378_v32 = vmax.f32 %v1957_v18, 0.0  ;;  %v1971_v34 = vpop.xlane.xlu1 %714  ;;  %v793_v35 = vpop.permute.xlu0 %792  ;;  %v932_v48 = vrot.slane %v367_v0, %v1906_v4  ;;  %v1984_v50 = vadd.f32 %v920_v38, %v896_v36  ;;  %v908_v61 = vrot.slane %v367_v0, %v1892_v57 }
 0x267   :  { %v722_v13 = vadd.f32 %v721_v16, %v1971_v34  ;;  %v801_v41 = vsub.f32 %v1826_v22, %v793_v35  ;;  %v1297_v53 = vrot.slane %v1971_v34, %v1871_v47  ;;  %v1301_v37 = vrot.slane %v1971_v34, %v1896_v59 }
 0x268   :  { %1619 = vrsqrt.f32 %v378_v32  ;;  %v1305_v9 = vrot.slane %v1971_v34, %v1906_v4  ;;  %v1277_v10 = vrot.slane %v1971_v34, %v1822_v20  ;;  %v1232_v8 = vrot.slane %v1890_v56, %v1822_v20 }
 0x269   :  { %v1979_v28 = vsub.f32 %v722_v13, %v723_v33  ;;  %v899_v27 = vsub.f32 %v801_v41, %v883_v17  ;;  %v1997_v36 = vadd.f32 %v1297_v53, %v1270_v58  ;;  %v1999_v63 = vadd.f32 %v1301_v37, %v1271_v23 }
 0x26a   :  { %v751_v45 = vpop.permute.xlu1 %750  ;;  %v1166_v46 = vpop.permute.xlu0 %1165  ;;  %v1221_v7 = vcombine.high %v1882_v52, %v1882_v52  ;;  %vm381_vm6 = vcmp.eq.f32.partialorder %v378_v32, inf  ;;  %v384_v16 = vand.u32 2147483648, %v378_v32  ;;  %vm383_vm7 = vcmp.eq.f32.partialorder %v378_v32, 0.0 }
 0x26b   :  { %v726_v54 = vmax.f32 %v1979_v28, 0.0  ;;  %v795_v55 = vsub.f32 %v1826_v22, %v751_v45  ;;  %v1174_v40 = vsub.f32 %v1840_v29, %v1166_v46  ;;  %v1995_v62 = vadd.f32 %v932_v48, %v899_v27 }
 0x26c   :  { %v1228_v22 = vrot.slane %v1882_v52, %v1822_v20  ;;  %v1281_v35 = vrot.slane %v1971_v34, %v1892_v57  ;;  %v1223_v13 = vcombine.high %v1890_v56, %v1890_v56  ;;  %v1236_v42 = vrot.slane %v1221_v7, %v1822_v20 }
 0x26d   :  { %1621 = vrsqrt.f32 %v726_v54  ;;  %v893_v5 = vsub.f32 %v795_v55, %v859_v44  ;;  %v1272_v6 = vsub.f32 %v1174_v40, %v1256_v60  ;;  %vm729_vm8 = vcmp.eq.f32.partialorder %v726_v54, inf }
 0x26e   :  { %v1117_v1 = vpop.permute.xlu1 %1116  ;;  %v732_v48 = vand.u32 2147483648, %v726_v54  ;;  %vm731_vm9 = vcmp.eq.f32.partialorder %v726_v54, 0.0  ;;  %v1240_v56 = vrot.slane %v1223_v13, %v1822_v20  ;;  %vm377_vm10 = vcmp.gt.f32.partialorder %v1957_v18, 0.0 }
 0x26f   :  { %v1167_v43 = vsub.f32 %v1840_v29, %v1117_v1  ;;  %v2006_v3 = vadd.f32 %v908_v61, %v893_v5  ;;  %v2008_v0 = vadd.f32 %v1305_v9, %v1272_v6  ;;  %v1289_v6 = vrot.slane %v1971_v34, %v1844_v31 }
 0x270   :  { %v1244_v1 = vrot.slane %v1879_v51, %v1822_v20  ;;  %vm725_vm11 = vcmp.gt.f32.partialorder %v1979_v28, 0.0 }
 0x271   :  { %v1265_v58 = vsub.f32 %v1167_v43, %v1228_v22 }
 0x272   :  { %v1620_v2 = vpop.eup %1619  ;;  %v1124_v11 = vpop.permute.xlu1 %1123 }
 0x273   :  { %v1168_v12 = vsub.f32 %v1840_v29, %v1124_v11  ;;  %v380_v14 = vmul.f32 %v1620_v2, %v378_v32  ;;  %v2017_v15 = vadd.f32 %v1277_v10, %v1265_v58  ;;  %v1293_v58 = vrot.slane %v1971_v34, %v1857_v39 }
 0x275   :  { %v1266_v23 = vsub.f32 %v1168_v12, %v1232_v8  ;;  %v382_v33 = vsel %vm381_vm6, %v378_v32, %v380_v14  ;;  %v1285_v32 = vrot.slane %v1971_v34, %v1832_v26 }
 0x276   :  { %v1131_v38 = vpop.permute.xlu1 %1130  ;;  %v385_v17 = vsel %vm383_vm7, %v384_v16, %v382_v33 }
 0x277   :  { %v1622_v41 = vpop.eup %1621  ;;  %v1169_v52 = vsub.f32 %v1840_v29, %v1131_v38  ;;  %v386_v27 = vmax.f32 %v385_v17, 1e-12  ;;  %v2025_v44 = vadd.f32 %v1281_v35, %v1266_v23 }
 0x278   :  { %v728_v45 = vmul.f32 %v1622_v41, %v726_v54 }
 0x279   :  { %v1267_v46 = vsub.f32 %v1169_v52, %v1236_v42  ;;  %1623 = vrcp.f32 %v386_v27 }
 0x27a   :  { %v1138_v53 = vpop.permute.xlu1 %1137  ;;  %v730_v37 = vsel %vm729_vm8, %v726_v54, %v728_v45 }
 0x27b   :  { %v1170_v55 = vsub.f32 %v1840_v29, %v1138_v53  ;;  %v733_v60 = vsel %vm731_vm9, %v732_v48, %v730_v37  ;;  %v2031_v40 = vadd.f32 %v1285_v32, %v1267_v46 }
 0x27c   :  { %v734_v61 = vmax.f32 %v733_v60, 1e-12 }
 0x27d   :  { %v1268_v5 = vsub.f32 %v1170_v55, %v1240_v56 }
 0x27e   :  { %v1145_v9 = vpop.permute.xlu1 %1144  ;;  %1625 = vrcp.f32 %v734_v61 }
 0x27f   :  { %v1171_v22 = vsub.f32 %v1840_v29, %v1145_v9  ;;  %v2038_v54 = vadd.f32 %v1289_v6, %v1268_v5 }
 0x281   :  { %v1269_v43 = vsub.f32 %v1171_v22, %v1244_v1 }
 0x283   :  { %v1624_v10 = vpop.eup %1623  ;;  %v2043_v2 = vadd.f32 %v1293_v58, %v1269_v43 }
 0x284   :  { %v389_v8 = vsel %vm377_vm10, %v1624_v10, 0.0 }
 0x285   :  { %v959_v11 = vrot.slane %v389_v8, %v1892_v57  ;;  %v952_v12 = vrot.slane %v389_v8, %v1822_v20  ;;  %v1021_v29 = vrot.slane %v389_v8, %v1824_v21  ;;  %v1014_v51 = vcombine.high %v389_v8, %v389_v8 }
 0x286   :  { %v966_v28 = vrot.slane %v389_v8, %v1832_v26  ;;  %v987_v41 = vrot.slane %v389_v8, %v1871_v47  ;;  %v994_v46 = vrot.slane %v389_v8, %v1896_v59  ;;  %v973_v56 = vrot.slane %v389_v8, %v1844_v31 }
 0x287   :  { %961 = vbcast.lane.b32.xlu0 %v959_v11, 256  ;;  %954 = vbcast.lane.b32.xlu1 %v952_v12, 256  ;;  %v2050_v34 = vrot.slane %v1021_v29, %v1824_v21  ;;  %v1029_v18 = vcombine.high %v1021_v29, %v1021_v29  ;;  %v1028_v16 = vrot.slane %v1014_v51, %v1824_v21 }
 0x288   :  { %v1626_v7 = vpop.eup %1625  ;;  %v1001_v55 = vrot.slane %v389_v8, %v1906_v4  ;;  %v980_v61 = vrot.slane %v389_v8, %v1857_v39 }
 0x289   :  { %v737_v14 = vsel %vm725_vm11, %v1626_v7, 0.0  ;;  %v2056_v35 = vrot.slane %v1029_v18, %v1824_v21  ;;  %v1030_v13 = vcombine.high %v1028_v16, %v1028_v16  ;;  %v2061_v17 = vrot.slane %v1028_v16, %v1824_v21 }
 0x28a   :  { %v1332_v23 = vrot.slane %v737_v14, %v1892_v57  ;;  %v1325_v33 = vrot.slane %v737_v14, %v1822_v20  ;;  %v1394_v38 = vrot.slane %v737_v14, %v1824_v21  ;;  %v1387_v52 = vcombine.high %v737_v14, %v737_v14 }
 0x28b   :  { %v2068_v27 = vrot.slane %v1030_v13, %v1824_v21  ;;  %v1339_v32 = vrot.slane %v737_v14, %v1832_v26  ;;  %v1346_v26 = vrot.slane %v737_v14, %v1844_v31  ;;  %v1353_v5 = vrot.slane %v737_v14, %v1857_v39 }
 0x28c   :  { %1334 = vbcast.lane.b32.xlu1 %v1332_v23, 256  ;;  %1327 = vbcast.lane.b32.xlu0 %v1325_v33, 256  ;;  %v1402_v42 = vcombine.high %v1394_v38, %v1394_v38  ;;  %v2065_v57 = vrot.slane %v1394_v38, %v1824_v21  ;;  %v1401_v48 = vrot.slane %v1387_v52, %v1824_v21 }
 0x28d   :  { %v1360_v6 = vrot.slane %v737_v14, %v1871_v47  ;;  %v1367_v9 = vrot.slane %v737_v14, %v1896_v59  ;;  %v1066_v31 = vrot.slane %v2050_v34, %v1822_v20  ;;  %v1070_v39 = vrot.slane %v2056_v35, %v1822_v20 }
 0x28e   :  { %v2071_v45 = vrot.slane %v1402_v42, %v1824_v21  ;;  %v2077_v53 = vrot.slane %v1401_v48, %v1824_v21  ;;  %v1403_v37 = vcombine.high %v1401_v48, %v1401_v48  ;;  %v1439_v12 = vrot.slane %v2065_v57, %v1822_v20 }
 0x28f   :  { %v1432_v16 = vcombine.high %v2065_v57, %v2065_v57  ;;  %v1061_v13 = vcombine.high %v2056_v35, %v2056_v35 }
 0x290   :  { %968 = vbcast.lane.b32.xlu1 %v966_v28, 256  ;;  %989 = vbcast.lane.b32.xlu0 %v987_v41, 256  ;;  %v2082_v60 = vrot.slane %v1403_v37, %v1824_v21  ;;  %v1374_v21 = vrot.slane %v737_v14, %v1906_v4  ;;  %v1443_v4 = vrot.slane %v2071_v45, %v1822_v20 }
 0x291   :  { %v1062_v37 = vcombine.high %v2068_v27, %v2068_v27 }
 0x294   :  { %1341 = vbcast.lane.b32.xlu1 %v1339_v32, 256  ;;  %996 = vbcast.lane.b32.xlu0 %v994_v46, 256 }
 0x298   :  { %975 = vbcast.lane.b32.xlu1 %v973_v56, 256  ;;  %1003 = vbcast.lane.b32.xlu0 %v1001_v55, 256 }
 0x29c   :  { %1348 = vbcast.lane.b32.xlu1 %v1346_v26, 256 }
 0x2a0   :  { %982 = vbcast.lane.b32.xlu1 %v980_v61, 256 }
 0x2a4   :  { %1355 = vbcast.lane.b32.xlu1 %v1353_v5, 256 }
 0x2a8   :  { %1362 = vbcast.lane.b32.xlu1 %v1360_v6, 256 }
 0x2ac   :  { %1369 = vbcast.lane.b32.xlu1 %v1367_v9, 256  ;;  %v1078_v9 = vrot.slane %v1061_v13, %v1822_v20 }
 0x2b0   :  { %1376 = vbcast.lane.b32.xlu1 %v1374_v21, 256  ;;  %v1434_v21 = vcombine.high %v2071_v45, %v2071_v45 }
 0x2f9   :  { %v955_v1 = vpop.permute.xlu1 %954  ;;  %v962_v22 = vpop.permute.xlu0 %961 }
 0x2fa   :  { %v1005_v43 = vmul.f32 %v955_v1, %v1959_v49  ;;  %v1006_v58 = vmul.f32 %v962_v22, %v2006_v3  ;;  %v1059_v49 = vcombine.high %v2050_v34, %v2050_v34  ;;  %v1060_v3 = vcombine.high %v2061_v17, %v2061_v17 }
 0x2fb   :  { %v1086_v34 = vrot.slane %v2068_v27, %v1822_v20 }
 0x2fc   :  { %v1103_v47 = vmul.f32 %v1066_v31, %v1005_v43  ;;  %v1104_v10 = vmul.f32 %v1070_v39, %v1006_v58  ;;  %v1090_v28 = vrot.slane %v1060_v3, %v1822_v20 }
 0x2fe   :  { %v1335_v8 = vpop.permute.xlu1 %1334  ;;  %v1328_v59 = vpop.permute.xlu0 %1327 }
 0x2ff   :  { %v1379_v11 = vmul.f32 %v1335_v8, %v2025_v44  ;;  %v1378_v29 = vmul.f32 %v1328_v59, %v2017_v15  ;;  %v1074_v15 = vrot.slane %v1059_v49, %v1822_v20 }
 0x301   :  { %v1477_v51 = vmul.f32 %v1443_v4, %v1379_v11  ;;  %v1476_v7 = vmul.f32 %v1439_v12, %v1378_v29  ;;  %v1451_v29 = vrot.slane %v1434_v21, %v1822_v20 }
 0x302   :  { %v969_v14 = vpop.permute.xlu1 %968  ;;  %v990_v18 = vpop.permute.xlu0 %989 }
 0x303   :  { %v1485_v23 = vsub.f32 %v1104_v10, %v1477_v51  ;;  %v1484_v44 = vsub.f32 %v1103_v47, %v1476_v7  ;;  %v1007_v33 = vmul.f32 %v969_v14, %v1961_v19  ;;  %v1010_v38 = vmul.f32 %v990_v18, %v1963_v24 }
 0x304   :  { %v1447_v19 = vrot.slane %v1432_v16, %v1822_v20 }
 0x305   :  { %v1493_v41 = vand.u32 2147483647, %v1485_v23  ;;  %v1509_v42 = vmul.f32 0.5, %v1485_v23  ;;  %v1492_v52 = vand.u32 2147483647, %v1484_v44  ;;  %v1508_v57 = vmul.f32 0.5, %v1484_v44 }
 0x306   :  { %v1105_v32 = vmul.f32 %v1074_v15, %v1007_v33  ;;  %v2116_v46 = vmul.f32 %v1086_v34, %v1010_v38  ;;  %v1342_v24 = vpop.permute.xlu1 %1341  ;;  %v997_v48 = vpop.permute.xlu0 %996 }
 0x307   :  { %vm1501_vm12 = vcmp.lt.f32.partialorder %v1493_v41, 1.0  ;;  %v1517_v56 = vmul.f32 %v1509_v42, %v1485_v23  ;;  %v1586_v55 = vadd.f32 -0.5, %v1493_v41  ;;  %vm1500_vm13 = vcmp.lt.f32.partialorder %v1492_v52, 1.0 }
 0x308   :  { %v1516_v26 = vmul.f32 %v1508_v57, %v1484_v44  ;;  %v1585_v35 = vadd.f32 -0.5, %v1492_v52  ;;  %v1380_v61 = vmul.f32 %v1342_v24, %v2031_v40  ;;  %v1011_v5 = vmul.f32 %v997_v48, %v1965_v25 }
 0x309   :  { %v1533_v6 = vsel %vm1501_vm12, %v1517_v56, %v1586_v55  ;;  %v1094_v25 = vrot.slane %v1062_v37, %v1822_v20  ;;  %v1433_v48 = vcombine.high %v2077_v53, %v2077_v53 }
 0x30a   :  { %v1541_v1 = vsel %vm364_vm5, %v1533_v6, 0.0  ;;  %v1532_v22 = vsel %vm1500_vm13, %v1516_v26, %v1585_v35  ;;  %v1478_v27 = vmul.f32 %v1447_v19, %v1380_v61  ;;  %v2127_v31 = vmul.f32 %v1090_v28, %v1011_v5  ;;  %v976_v43 = vpop.permute.xlu1 %975  ;;  %v1004_v39 = vpop.permute.xlu0 %1003 }
 0x30b   :  { %v1540_v58 = vsel %vm364_vm5, %v1532_v22, 0.0  ;;  %v1008_v40 = vmul.f32 %v976_v43, %v1967_v30  ;;  %v1012_v47 = vmul.f32 %v1004_v39, %v1995_v62  ;;  %v1082_v62 = vrot.slane %v2061_v17, %v1822_v20 }
 0x30c   :  { %v1486_v10 = vsub.f32 %v1105_v32, %v1478_v27  ;;  %v1542_v8 = vadd.f32 %v1541_v1, %v1540_v58  ;;  %v1459_v32 = vrot.slane %v2082_v60, %v1822_v20  ;;  %v1463_v6 = vrot.slane %v1433_v48, %v1822_v20 }
 0x30d   :  { %v1106_v59 = vmul.f32 %v1078_v9, %v1008_v40  ;;  %v2133_v45 = vmul.f32 %v1094_v25, %v1012_v47 }
 0x30e   :  { %v1494_v4 = vand.u32 2147483647, %v1486_v10  ;;  %v1510_v11 = vmul.f32 0.5, %v1486_v10  ;;  %v1349_v12 = vpop.permute.xlu1 %1348 }
 0x30f   :  { %v1381_v49 = vmul.f32 %v1349_v12, %v2038_v54  ;;  %v1455_v54 = vrot.slane %v2077_v53, %v1822_v20 }
 0x310   :  { %vm1502_vm14 = vcmp.lt.f32.partialorder %v1494_v4, 1.0  ;;  %v1518_v3 = vmul.f32 %v1510_v11, %v1486_v10  ;;  %v1587_v51 = vadd.f32 -0.5, %v1494_v4 }
 0x311   :  { %v1479_v30 = vmul.f32 %v1451_v29, %v1381_v49 }
 0x312   :  { %v1534_v7 = vsel %vm1502_vm14, %v1518_v3, %v1587_v51  ;;  %v983_v14 = vpop.permute.xlu1 %982 }
 0x313   :  { %v1487_v18 = vsub.f32 %v1106_v59, %v1479_v30  ;;  %v1009_v16 = vmul.f32 %v983_v14, %v1984_v50  ;;  %v1543_v23 = vsel %vm364_vm5, %v1534_v7, 0.0 }
 0x314   :  { %v1544_v44 = vadd.f32 %v1543_v23, %v1542_v8 }
 0x315   :  { %v1495_v33 = vand.u32 2147483647, %v1487_v18  ;;  %v1511_v38 = vmul.f32 0.5, %v1487_v18  ;;  %v1107_v15 = vmul.f32 %v1082_v62, %v1009_v16 }
 0x316   :  { %v1356_v34 = vpop.permute.xlu1 %1355 }
 0x317   :  { %vm1503_vm15 = vcmp.lt.f32.partialorder %v1495_v33, 1.0  ;;  %v1519_v28 = vmul.f32 %v1511_v38, %v1487_v18  ;;  %v1588_v13 = vadd.f32 -0.5, %v1495_v33  ;;  %v1382_v41 = vmul.f32 %v1356_v34, %v2043_v2 }
 0x318   :  { %v1435_v2 = vcombine.high %v2082_v60, %v2082_v60 }
 0x319   :  { %v1480_v42 = vmul.f32 %v1455_v54, %v1382_v41  ;;  %v1535_v52 = vsel %vm1503_vm15, %v1519_v28, %v1588_v13 }
 0x31a   :  { %v1363_v17 = vpop.permute.xlu1 %1362  ;;  %v1545_v50 = vsel %vm364_vm5, %v1535_v52, 0.0  ;;  %v1467_v22 = vrot.slane %v1435_v2, %v1822_v20 }
 0x31b   :  { %v1488_v57 = vsub.f32 %v1107_v15, %v1480_v42  ;;  %v1383_v19 = vmul.f32 %v1363_v17, %v1997_v36  ;;  %v1546_v24 = vadd.f32 %v1545_v50, %v1544_v44 }
 0x31d   :  { %v1496_v37 = vand.u32 2147483647, %v1488_v57  ;;  %v1512_v56 = vmul.f32 0.5, %v1488_v57  ;;  %v1481_v55 = vmul.f32 %v1459_v32, %v1383_v19 }
 0x31e   :  { %v1370_v26 = vpop.permute.xlu1 %1369 }
 0x31f   :  { %vm1504_vm0 = vcmp.lt.f32.partialorder %v1496_v37, 1.0  ;;  %v1520_v35 = vmul.f32 %v1512_v56, %v1488_v57  ;;  %v1589_v61 = vadd.f32 -0.5, %v1496_v37  ;;  %v1489_v5 = vsub.f32 %v2116_v46, %v1481_v55 }
 0x320   :  { %v1384_v36 = vmul.f32 %v1370_v26, %v1999_v63 }
 0x321   :  { %v1497_v9 = vand.u32 2147483647, %v1489_v5  ;;  %v1513_v21 = vmul.f32 0.5, %v1489_v5  ;;  %v1536_v1 = vsel %vm1504_vm0, %v1520_v35, %v1589_v61 }
 0x322   :  { %v1482_v53 = vmul.f32 %v1463_v6, %v1384_v36  ;;  %v1377_v27 = vpop.permute.xlu1 %1376  ;;  %v1547_v43 = vsel %vm364_vm5, %v1536_v1, 0.0 }
 0x323   :  { %v1521_v39 = vmul.f32 %v1513_v21, %v1489_v5  ;;  %v1590_v60 = vadd.f32 -0.5, %v1497_v9  ;;  %v1385_v58 = vmul.f32 %v1377_v27, %v2008_v0  ;;  %vm1505_vm1 = vcmp.lt.f32.partialorder %v1497_v9, 1.0 }
 0x324   :  { %v1490_v46 = vsub.f32 %v2127_v31, %v1482_v53  ;;  %v1548_v40 = vadd.f32 %v1547_v43, %v1546_v24 }
 0x325   :  { %v1483_v25 = vmul.f32 %v1467_v22, %v1385_v58  ;;  %v1537_v47 = vsel %vm1505_vm1, %v1521_v39, %v1590_v60 }
 0x326   :  { %v1498_v63 = vand.u32 2147483647, %v1490_v46  ;;  %v1514_v10 = vmul.f32 0.5, %v1490_v46  ;;  %v1549_v8 = vsel %vm364_vm5, %v1537_v47, 0.0 }
 0x327   :  { %v1491_v59 = vsub.f32 %v2133_v45, %v1483_v25  ;;  %v1550_v20 = vadd.f32 %v1549_v8, %v1548_v40 }
 0x328   :  { %v1522_v4 = vmul.f32 %v1514_v10, %v1490_v46  ;;  %vm1506_vm2 = vcmp.lt.f32.partialorder %v1498_v63, 1.0  ;;  %v1591_v11 = vadd.f32 -0.5, %v1498_v63 }
 0x329   :  { %v1515_v12 = vmul.f32 0.5, %v1491_v59  ;;  %v1499_v29 = vand.u32 2147483647, %v1491_v59 }
 0x32a   :  { %v1538_v49 = vsel %vm1506_vm2, %v1522_v4, %v1591_v11 }
 0x32b   :  { %vm1507_vm3 = vcmp.lt.f32.partialorder %v1499_v29, 1.0  ;;  %v1523_v0 = vmul.f32 %v1515_v12, %v1491_v59  ;;  %v1592_v3 = vadd.f32 -0.5, %v1499_v29  ;;  %v1551_v31 = vsel %vm364_vm5, %v1538_v49, 0.0 }
 0x32c   :  { %v1552_v51 = vadd.f32 %v1551_v31, %v1550_v20 }
 0x32d   :  { %v1539_v30 = vsel %vm1507_vm3, %v1523_v0, %v1592_v3 }
 0x32e   :  { %v1553_v7 = vsel %vm364_vm5, %v1539_v30, 0.0 }
 0x32f   :  { %v1554_v14 = vadd.f32 %v1553_v7, %v1552_v51 }
 0x331   :  { %v1555_v18 = vsel %vm364_vm5, %v1554_v14, 0.0 }
 0x332   :  { %1556 = vadd.xlane.f32.xlu0 %v1555_v18 }
 0x3bf   :  { %v1557_v45 = vpop.xlane.xlu0 %1556 }
 0x3c0   :  { %v1558_v62 = vrot.slane %v1557_v45, 4 }
 0x3c2   :  { %v1559_v16 = vadd.f32 %v1558_v62, %v1557_v45 }
 0x3c4   :  { %v1560_v23 = vrot.slane %v1559_v16, 2 }
 0x3c6   :  { %v1561_v44 = vadd.f32 %v1560_v23, %v1559_v16 }
 0x3c8   :  { %v1562_v33 = vrot.slane %v1561_v44, 1 }
 0x3ca   :  { %v1563_v38 = vadd.f32 %v1562_v33, %v1561_v44 }
 0x3cc   :  { %1605 = vpush %v1563_v38 }
 0x3fd   :  { %s1606_s5 = spop %1605 }
 0x3fe   :  { %v1565_v15 = vstv %s1606_s5 }
 0x3ff   :  { %v1566_v54 = vmul.f32 0.09765625, %v1565_v15 }
 0x401   :  { %1568 = vst.msk [vmem:[#allocation7] sm:$0x1] %vm1567_vm4, %v1566_v54 }
 0x402   :  { %1682 = shalt.err (!%p1679_p6)
}
 0x403   :  { %s1683_s10 = scalar_lea.hbm %s2178_s2, 16 }
 0x404   :  { %p1684_p7 = scmp.ne.s32.totalorder %s2178_s2, %s1683_s10  ;;  %p1687_p8 = scmp.lt.u32.totalorder %s1683_s10, %s2178_s2 }
 0x406   :  { %p1689_p9 = pnand %p1687_p8, %p1684_p7 }
 0x408   :  { %1692 = shalt.err (!%p1689_p9)
}
 0x409   :  { %1578 = dma.vmem_to_hbm [thread:$0]  %s1576_s4, 16, %s2178_s2, [#allocation4]  }
 0x40a   :  { %1697 = dma.done.wait [#allocation4], 16  }
 0x40b   :  { %1698 = vsyncadd [#allocation4], 4294967280 }
 0x40c   :  { %1582 = vsyncpa [#allocation3], 1 }
 0x40d   :  { %1583 = vsyncpa [#allocation6], 1 }
 0x40e   :  { %1584 = vsyncpa [#allocation4], 1 }

</bundles_post_ra>
